<compile_context>
chip_gen: v7x
topology: tpu7x:2x2x1
jax: 0.10.0
libtpu: 0.0.40
codegen_flags: <defaults>
</compile_context>

<pallas_src>
import functools

import jax
import jax.numpy as jnp
from jax.experimental import pallas as pl
from jax.experimental.pallas import tpu as pltpu

LANE = 128
SUB = 8
MAX_TILE_ROWS = 1024  # 1024 rows x 128 lanes = 131072 events per tile


def _cdiv(a, b):
    return -(-a // b)


def _round_up(a, b):
    return _cdiv(a, b) * b


# ----------------------------------------------------------------------------
# Pallas kernel: per-event NLL terms, lane-dense, resident accumulator
# ----------------------------------------------------------------------------
def _nll_kernel(slab_ref, out_ref, acc_ref, *, dim):
    """Per (core-split, event-tile) step.

    slab_ref : (F, TR, 128) f32   F = 2*dim+3 fields:
                                  [xs_0..xs_{D-1} | xr_0..xr_{D-1} |
                                   beta_s+beta_r | is_event | delta_t]
    out_ref  : (1, 8, 128) f32    per-core partial sums (written once)
    acc_ref  : (8, 128) f32       VMEM scratch accumulator
    """
    i = pl.program_id(1)  # event-tile index within this core split

    @pl.when(i == 0)
    def _init():
        acc_ref[...] = jnp.zeros_like(acc_ref)

    # squared distance via per-field (TR, 128) lane-dense slices: pure VALU
    d0 = slab_ref[0] - slab_ref[dim]
    sq = d0 * d0
    for k in range(1, dim):
        dk = slab_ref[k] - slab_ref[dim + k]
        sq = sq + dk * dk

    bsum = slab_ref[2 * dim]          # beta_s + beta_r (pre-summed in wrapper)
    ev = slab_ref[2 * dim + 1]
    dt = slab_ref[2 * dim + 2]

    log_lam = bsum - sq               # (TR, 128)
    lam = jnp.exp(log_lam)            # EUP
    contrib = lam * dt - ev * log_lam  # zero-padded rows contribute exactly 0

    # fold TR rows down to 8 sublanes: elementwise adds of aligned vregs (VALU)
    tr = contrib.shape[0]
    acc_ref[...] += contrib.reshape(tr // SUB, SUB, LANE).sum(axis=0)

    @pl.when(i == pl.num_programs(1) - 1)
    def _finalize():
        out_ref[...] = acc_ref[...].reshape(out_ref.shape)


def _num_splits():
    """2-way event-tile split only on dual-TensorCore chips (v4/v5p/v7x)."""
    try:
        kind = jax.devices()[0].device_kind.lower()
    except Exception:
        return 1
    if "v7" in kind or "7x" in kind or "v4" in kind or "v5p" in kind:
        return 2
    return 1


# ----------------------------------------------------------------------------
# JAX glue: parameter setup, gathers, piecewise-velocity positions
# ----------------------------------------------------------------------------
def init_params(key, nodes_num, bins_num, dim, k, prior_lambda):
    """Deterministic re-creation of LearningModel.__init__ parameter shapes."""
    k0, k1, k2 = jax.random.split(key, 3)
    x0 = 2.0 * jax.random.uniform(k0, (nodes_num, dim), jnp.float32) - 1.0
    v = jnp.zeros((bins_num, nodes_num, dim), jnp.float32)
    beta = jnp.zeros((nodes_num, 2), jnp.float32)
    prior_sigma = 2.0 * jax.random.uniform(k1, (1,), jnp.float32) - 1.0
    prior_C_Q = 2.0 * jax.random.uniform(k2, (nodes_num, k), jnp.float32) - 1.0
    return dict(x0=x0, v=v, beta=beta, prior_sigma=prior_sigma,
                prior_C_Q=prior_C_Q,
                prior_lambda=jnp.asarray(prior_lambda, jnp.float32))


def node_positions(x0, v, node_idx, t, last_time=1.0):
    """x_i(t) under piecewise-constant velocity over `bins_num` equal bins."""
    bins_num = v.shape[0]
    bin_w = last_time / bins_num
    bin_idx = jnp.clip(jnp.floor(t / bin_w).astype(jnp.int32), 0, bins_num - 1)
    cum_v = jnp.concatenate(
        [jnp.zeros((1,) + v.shape[1:], v.dtype), jnp.cumsum(v, axis=0)],
        axis=0) * bin_w
    resid = (t - bin_idx.astype(jnp.float32) * bin_w)[:, None]
    return x0[node_idx] + cum_v[bin_idx, node_idx] + v[bin_idx, node_idx] * resid


@jax.jit
def forward(params, nodes, pairs, states, borders, is_event, delta_t):
    """Mirrors LearningModel.forward -> (average nll, neg-log-prior)."""
    del nodes  # TODO(synk): real get_neg_log_prior may restrict to batch nodes
    x0, v, beta = params["x0"], params["v"], params["beta"]
    E = borders.shape[0]
    D = x0.shape[1]
    F = 2 * D + 3

    # gathers (data-dependent indexing stays in JAX glue)
    i_idx, j_idx = pairs[0], pairs[1]
    xs = node_positions(x0, v, i_idx, borders)                       # (E, D)
    xr = node_positions(x0, v, j_idx, borders)                       # (E, D)
    bsum = (beta[i_idx, states] + beta[j_idx, states]).astype(jnp.float32)
    ev = is_event.astype(jnp.float32)
    dt = delta_t.astype(jnp.float32)

    # lane-dense packing: (F, rows, 128) with the event index on (row, lane)
    fields = ([xs[:, k].astype(jnp.float32) for k in range(D)]
              + [xr[:, k].astype(jnp.float32) for k in range(D)]
              + [bsum, ev, dt])
    stacked = jnp.stack(fields, axis=0)                              # (F, E)

    num_splits = _num_splits()
    rows = _cdiv(E, LANE)
    rows_per_core = _cdiv(rows, num_splits)
    tr = min(MAX_TILE_ROWS, _round_up(rows_per_core, SUB))
    tiles_per_core = _cdiv(rows_per_core, tr)
    total_rows = num_splits * tiles_per_core * tr
    e_pad = total_rows * LANE

    slab = jnp.pad(stacked, ((0, 0), (0, e_pad - E)))
    slab = slab.reshape(F, total_rows, LANE)

    out = pl.pallas_call(
        functools.partial(_nll_kernel, dim=D),
        out_shape=jax.ShapeDtypeStruct((num_splits, SUB, LANE), jnp.float32),
        grid=(num_splits, tiles_per_core),
        in_specs=[
            pl.BlockSpec((F, tr, LANE),
                         lambda c, i, T=tiles_per_core: (0, c * T + i, 0)),
        ],
        out_specs=pl.BlockSpec((1, SUB, LANE), lambda c, i: (c, 0, 0)),
        scratch_shapes=[pltpu.VMEM((SUB, LANE), jnp.float32)],
        compiler_params=pltpu.CompilerParams(
            dimension_semantics=("parallel", "arbitrary"),
            vmem_limit_bytes=32 * 1024 * 1024),
    )(slab)

    avg_nll = jnp.sum(out) / jnp.float32(E)

    # Prior (isotropic Gaussian part) — tiny reduction, kept in the wrapper so
    # it is not recomputed per core and needs no extra DMA streams.
    ssq = jnp.sum(v * v) + jnp.sum(x0 * x0)
    sigma_sq = jnp.exp(2.0 * params["prior_sigma"][0])
    nlp = 0.5 * params["prior_lambda"] ** 2 * ssq / sigma_sq
    return avg_nll, nlp


def forward_reference(params, nodes, pairs, states, borders, is_event, delta_t):
    """Pure-JAX reference of the same math (for a sanity check)."""
    x0, v, beta = params["x0"], params["v"], params["beta"]
    i_idx, j_idx = pairs[0], pairs[1]
    xs = node_positions(x0, v, i_idx, borders)
    xr = node_positions(x0, v, j_idx, borders)
    sq = jnp.sum((xs - xr) ** 2, axis=-1)
    log_lam = beta[i_idx, states] + beta[j_idx, states] - sq
    lam = jnp.exp(log_lam)
    nll = jnp.sum(-is_event.astype(jnp.float32) * log_lam + lam * delta_t)
    nll = nll / jnp.float32(borders.shape[0])
    sigma_sq = jnp.exp(2.0 * params["prior_sigma"][0])
    nlp = 0.5 * params["prior_lambda"] ** 2 * (
        jnp.sum(v * v) + jnp.sum(x0 * x0)) / sigma_sq
    return nll, nlp


# ----------------------------------------------------------------------------
if __name__ == "__main__":
    NODES_NUM, BINS_NUM, DIM, K = 8, 4, 2, 10
    E = 64  # number of intervals/events in the batch

    key = jax.random.PRNGKey(0)
    kp, kd = jax.random.split(key)
    params = init_params(kp, NODES_NUM, BINS_NUM, DIM, K, prior_lambda=10000.0)

    # deterministic synthetic batch (what __train_one_batch would hand to forward)
    k1, k2, k3, k4, k5, k6 = jax.random.split(kd, 6)
    nodes = jnp.arange(NODES_NUM, dtype=jnp.int32)
    src = jax.random.randint(k1, (E,), 0, NODES_NUM - 1, jnp.int32)
    dst = jax.random.randint(k2, (E,), 1, NODES_NUM, jnp.int32)
    dst = jnp.where(dst <= src, src + 1, dst)               # i < j
    pairs = jnp.stack([src, dst], axis=0)                    # (2, E)
    borders = jax.random.uniform(k3, (E,), jnp.float32)      # times in [0, 1)
    states = jax.random.randint(k4, (E,), 0, 2, jnp.int32)   # link state {0,1}
    is_event = (jax.random.uniform(k5, (E,)) > 0.5).astype(jnp.int32)
    delta_t = jnp.minimum(jax.random.uniform(k6, (E,)) * 0.2, 1.0 - borders)

    nll, nlp = forward(params, nodes, pairs, states, borders, is_event, delta_t)
    jax.block_until_ready((nll, nlp))

    nll_ref, nlp_ref = forward_reference(params, nodes, pairs, states, borders,
                                         is_event, delta_t)
    assert jnp.allclose(nll, nll_ref, rtol=1e-5, atol=1e-4), (nll, nll_ref)
    assert jnp.allclose(nlp, nlp_ref, rtol=1e-4, atol=1e-2), (nlp, nlp_ref)

    print("KERNEL_OK")
</pallas_src>

<mosaic_0001>
module attributes {stable_mosaic.version = 11 : i64} {
  func.func @_nll_kernel(%arg0: i32, %arg1: i32, %arg2: memref<7x8x128xf32, #tpu.memory_space<vmem>>, %arg3: memref<1x8x128xf32, #tpu.memory_space<vmem>>, %arg4: memref<8x128xf32, #tpu.memory_space<vmem>>) attributes {dimension_semantics = [#tpu.dimension_semantics<parallel>, #tpu.dimension_semantics<arbitrary>], iteration_bounds = array<i64: 1, 1>, scalar_prefetch = 0 : i64, scratch_operands = 1 : i64, tpu.core_type = #tpu.core_type<tc>, window_params = [{transform_indices = @transform_0, window_bounds = array<i64: 7, 8, 128>}, {transform_indices = @transform_1, window_bounds = array<i64: 1, 8, 128>}]} {
    %c0_i32 = arith.constant 0 : i32
    %0 = arith.cmpi eq, %arg1, %c0_i32 : i32
    %1 = arith.extui %0 : i1 to i32
    %c0_i32_0 = arith.constant 0 : i32
    %2 = arith.cmpi ne, %1, %c0_i32_0 : i32
    scf.if %2 {
      %cst_21 = arith.constant 0.000000e+00 : f32
      %35 = vector.broadcast %cst_21 : f32 to vector<8x128xf32>
      %c0_22 = arith.constant 0 : index
      %c0_23 = arith.constant 0 : index
      %36 = vector.load %arg4[%c0_22, %c0_23] : memref<8x128xf32, #tpu.memory_space<vmem>>, vector<8x128xf32>
      tpu.vector_store %arg4[%c0_22, %c0_23], %35 {strides = array<i32>} : memref<8x128xf32, #tpu.memory_space<vmem>>, vector<8x128xf32>,
    } else {
    }
    %c0 = arith.constant 0 : index
    %c0_1 = arith.constant 0 : index
    %c0_2 = arith.constant 0 : index
    %3 = vector.load %arg2[%c0, %c0_1, %c0_2] : memref<7x8x128xf32, #tpu.memory_space<vmem>>, vector<1x8x128xf32>
    %4 = vector.shape_cast %3 : vector<1x8x128xf32> to vector<8x128xf32>
    %c2 = arith.constant 2 : index
    %c0_3 = arith.constant 0 : index
    %c0_4 = arith.constant 0 : index
    %5 = vector.load %arg2[%c2, %c0_3, %c0_4] : memref<7x8x128xf32, #tpu.memory_space<vmem>>, vector<1x8x128xf32>
    %6 = vector.shape_cast %5 : vector<1x8x128xf32> to vector<8x128xf32>
    %7 = arith.subf %4, %6 : vector<8x128xf32>
    %8 = arith.mulf %7, %7 : vector<8x128xf32>
    %c1 = arith.constant 1 : index
    %c0_5 = arith.constant 0 : index
    %c0_6 = arith.constant 0 : index
    %9 = vector.load %arg2[%c1, %c0_5, %c0_6] : memref<7x8x128xf32, #tpu.memory_space<vmem>>, vector<1x8x128xf32>
    %10 = vector.shape_cast %9 : vector<1x8x128xf32> to vector<8x128xf32>
    %c3 = arith.constant 3 : index
    %c0_7 = arith.constant 0 : index
    %c0_8 = arith.constant 0 : index
    %11 = vector.load %arg2[%c3, %c0_7, %c0_8] : memref<7x8x128xf32, #tpu.memory_space<vmem>>, vector<1x8x128xf32>
    %12 = vector.shape_cast %11 : vector<1x8x128xf32> to vector<8x128xf32>
    %13 = arith.subf %10, %12 : vector<8x128xf32>
    %14 = arith.mulf %13, %13 : vector<8x128xf32>
    %15 = arith.addf %8, %14 : vector<8x128xf32>
    %c4 = arith.constant 4 : index
    %c0_9 = arith.constant 0 : index
    %c0_10 = arith.constant 0 : index
    %16 = vector.load %arg2[%c4, %c0_9, %c0_10] : memref<7x8x128xf32, #tpu.memory_space<vmem>>, vector<1x8x128xf32>
    %17 = vector.shape_cast %16 : vector<1x8x128xf32> to vector<8x128xf32>
    %c5 = arith.constant 5 : index
    %c0_11 = arith.constant 0 : index
    %c0_12 = arith.constant 0 : index
    %18 = vector.load %arg2[%c5, %c0_11, %c0_12] : memref<7x8x128xf32, #tpu.memory_space<vmem>>, vector<1x8x128xf32>
    %19 = vector.shape_cast %18 : vector<1x8x128xf32> to vector<8x128xf32>
    %c6 = arith.constant 6 : index
    %c0_13 = arith.constant 0 : index
    %c0_14 = arith.constant 0 : index
    %20 = vector.load %arg2[%c6, %c0_13, %c0_14] : memref<7x8x128xf32, #tpu.memory_space<vmem>>, vector<1x8x128xf32>
    %21 = vector.shape_cast %20 : vector<1x8x128xf32> to vector<8x128xf32>
    %22 = arith.subf %17, %15 : vector<8x128xf32>
    %23 = math.exp %22 : vector<8x128xf32>
    %24 = arith.mulf %23, %21 : vector<8x128xf32>
    %25 = arith.mulf %19, %22 : vector<8x128xf32>
    %26 = arith.subf %24, %25 : vector<8x128xf32>
    %c0_15 = arith.constant 0 : index
    %c0_16 = arith.constant 0 : index
    %27 = vector.load %arg4[%c0_15, %c0_16] : memref<8x128xf32, #tpu.memory_space<vmem>>, vector<8x128xf32>
    %28 = vector.shape_cast %26 : vector<8x128xf32> to vector<1x8x128xf32>
    %cst = arith.constant dense<0.000000e+00> : vector<8x128xf32>
    %29 = vector.multi_reduction <add>, %28, %cst [0] : vector<1x8x128xf32> to vector<8x128xf32>
    %30 = arith.addf %27, %29 : vector<8x128xf32>
    %c0_17 = arith.constant 0 : index
    %c0_18 = arith.constant 0 : index
    %31 = vector.load %arg4[%c0_17, %c0_18] : memref<8x128xf32, #tpu.memory_space<vmem>>, vector<8x128xf32>
    tpu.vector_store %arg4[%c0_17, %c0_18], %30 {strides = array<i32>} : memref<8x128xf32, #tpu.memory_space<vmem>>, vector<8x128xf32>,
    %c0_i32_19 = arith.constant 0 : i32
    %32 = arith.cmpi eq, %arg1, %c0_i32_19 : i32
    %33 = arith.extui %32 : i1 to i32
    %c0_i32_20 = arith.constant 0 : i32
    %34 = arith.cmpi ne, %33, %c0_i32_20 : i32
    scf.if %34 {
      %c0_21 = arith.constant 0 : index
      %c0_22 = arith.constant 0 : index
      %35 = vector.load %arg4[%c0_21, %c0_22] : memref<8x128xf32, #tpu.memory_space<vmem>>, vector<8x128xf32>
      %36 = vector.shape_cast %35 : vector<8x128xf32> to vector<1x8x128xf32>
      %c0_23 = arith.constant 0 : index
      %c0_24 = arith.constant 0 : index
      %c0_25 = arith.constant 0 : index
      %37 = vector.load %arg3[%c0_23, %c0_24, %c0_25] : memref<1x8x128xf32, #tpu.memory_space<vmem>>, vector<1x8x128xf32>
      tpu.vector_store %arg3[%c0_23, %c0_24, %c0_25], %36 {strides = array<i32>} : memref<1x8x128xf32, #tpu.memory_space<vmem>>, vector<1x8x128xf32>,
    } else {
    }
    return
  }
  func.func @transform_0(%arg0: i32, %arg1: i32) -> (i32, i32, i32) {
    %c1_i32 = arith.constant 1 : i32
    %0 = arith.muli %arg0, %c1_i32 : i32
    %1 = arith.addi %0, %arg1 : i32
    %c0_i32 = arith.constant 0 : i32
    %c0_i32_0 = arith.constant 0 : i32
    %c0_i32_1 = arith.constant 0 : i32
    return %c0_i32, %1, %c0_i32_0 : i32, i32, i32
  }
  func.func @transform_1(%arg0: i32, %arg1: i32) -> (i32, i32, i32) {
    %c0_i32 = arith.constant 0 : i32
    %c0_i32_0 = arith.constant 0 : i32
    %c0_i32_1 = arith.constant 0 : i32
    return %arg0, %c0_i32, %c0_i32_0 : i32, i32, i32
  }
}

</mosaic_0001>

<bundles_post_ra>
// kernel: forward.1
= control target key start
LH: loop header
LB: loop body
LE: loop exit
PB: predicated region body
PF: predicated region fallthrough
CT: control target
= control target key end

     0   :  { %s115_s0 = inlined_call_operand.vmem [shape: f32[7,8,128], index: 0, kind: input, shape index: {}]   ;;  %s116_s1 = inlined_call_operand.vmem [shape: f32[1,8,128], index: 1, kind: output, shape index: {}]  }
   0x1   :  { %v30_v0 = vld [vmem:[%s115_s0] sm:$0xff]  ;;  %v73_v1 = vld [vmem:[%s115_s0 + $0x10] sm:$0xff]  ;;  %v74_v2 = vld [vmem:[%s115_s0 + $0x8] sm:$0xff] }
   0x2   :  { %v33_v3 = vsub.f32 %v30_v0, %v73_v1  ;;  %v75_v4 = vld [vmem:[%s115_s0 + $0x18] sm:$0xff]  ;;  %v76_v8 = vld [vmem:[%s115_s0 + $0x20] sm:$0xff]  ;;  %v77_v12 = vld [vmem:[%s115_s0 + $0x28] sm:$0xff] }
   0x3   :  { %v39_v5 = vsub.f32 %v74_v2, %v75_v4  ;;  %v78_v13 = vld [vmem:[%s115_s0 + $0x30] sm:$0xff] }
   0x4   :  { %v34_v6 = vmul.f32 %v33_v3, %v33_v3 }
   0x5   :  { %v40_v7 = vmul.f32 %v39_v5, %v39_v5 }
   0x7   :  { %v41_v9 = vadd.f32 %v40_v7, %v34_v6 }
   0x9   :  { %v48_v10 = vsub.f32 %v76_v8, %v41_v9 }
   0xb   :  { %v49_v11 = vmul.f32 1.442695, %v48_v10  ;;  %v52_v14 = vmul.f32 %v77_v12, %v48_v10 }
   0xd   :  { %79 = vpow2.f32 %v49_v11 }
  0x17   :  { %v80_v15 = vpop.eup %79 }
  0x18   :  { %v51_v16 = vmul.f32 %v80_v15, %v78_v13 }
  0x1a   :  { %v53_v17 = vsub.f32 %v51_v16, %v52_v14 }
  0x1c   :  { %62 = vst [vmem:[%s116_s1] sm:$0xff] %v53_v17 }

</bundles_post_ra>
